<compile_context>
chip_gen: v6e
topology: v6e:2x2x1
jax: 0.10.0
libtpu: 0.0.40
codegen_flags: <defaults>
</compile_context>

<pallas_src>
import functools

import jax
import jax.numpy as jnp
import numpy as np
from jax.experimental import pallas as pl
from jax.experimental.pallas import tpu as pltpu


def _rnn_kernel(x_ref, wx_ref, wh_ref, b_ref, out_ref, h_ref, *,
                batch_p, chunk_len):
    """One sequence chunk of the recurrence.

    x_ref  : (Ts*Bp, D)   time-major flattened inputs for this chunk
    wx_ref : (D, Lp)      input->hidden weight (transposed, lane-padded)
    wh_ref : (Lp, Lp)     hidden->hidden weight (transposed, lane-padded)
    b_ref  : (1, Lp)      bias (lane-padded with zeros)
    out_ref: (Ts*Bp, Lp)  hidden states for this chunk; also used as the
                          pre-activation staging slab (no extra VMEM scratch)
    h_ref  : (Bp, Lp)     VMEM scratch: hidden state carried across chunks
    """
    Bp, Ts = batch_p, chunk_len

    @pl.when(pl.program_id(0) == 0)
    def _():
        h_ref[...] = jnp.zeros_like(h_ref)   # h=None in PyTorch -> zero init

    # Hoisted per-chunk input projection: ONE MXU matmul covering every
    # timestep of this chunk, written straight into the output slab.
    out_ref[...] = (
        jnp.dot(x_ref[...], wx_ref[...], preferred_element_type=jnp.float32)
        + b_ref[...]
    )

    wh = wh_ref[...]  # hidden->hidden weight stays in vregs across the loop

    def step(t, h):
        row = pl.multiple_of(t * Bp, 8)          # aligned (Bp, Lp) tile
        pre = out_ref[pl.ds(row, Bp), :] + jnp.dot(
            h.astype(wh.dtype), wh, preferred_element_type=jnp.float32)
        h_new = jnp.tanh(pre)
        out_ref[pl.ds(row, Bp), :] = h_new       # lane-dense, unmasked store
        return h_new

    # Bounded unroll: full unroll only for short chunks, partial otherwise.
    unroll = True if Ts <= 8 else 8
    h_ref[...] = jax.lax.fori_loop(0, Ts, step, h_ref[...], unroll=unroll)


def rnn_forward(x_bsd, W, b, *, seq_chunk=4, mxu_dtype=jnp.float32):
    """x_bsd: (batch, seq, dim) f32; W: (latent, dim+latent); b: (latent,).

    Returns stacked hidden states (seq, batch, latent) == h_history[1:].
    """
    B, S, D = x_bsd.shape
    L = W.shape[0]
    assert W.shape == (L, D + L)

    Bp = ((B + 7) // 8) * 8            # sublane-pad batch
    Lp = ((L + 127) // 128) * 128      # lane-pad hidden width (lane-dense)
    Ts = max(1, min(seq_chunk, S))     # timesteps per grid step
    Sp = -(-S // Ts) * Ts              # seq padded to a whole number of chunks
    num_chunks = Sp // Ts

    # Split & transpose the concatenated Linear weight; zero-pad hidden width.
    # Padded hidden units stay exactly 0: their Wx/Wh columns and bias are 0,
    # and their (zero) Wh rows feed nothing back into real units.
    wx_t = jnp.zeros((D, Lp), jnp.float32).at[:, :L].set(W[:, :D].T)
    wh_t = jnp.zeros((Lp, Lp), jnp.float32).at[:L, :L].set(W[:, D:].T)
    b2 = jnp.zeros((1, Lp), jnp.float32).at[:, :L].set(b)

    # Pad batch / seq with zero rows (never mix with real rows; sliced off).
    x_p = jnp.pad(x_bsd, ((0, Bp - B), (0, Sp - S), (0, 0)))
    # Time-major flatten (row = t*Bp + b) so each chunk's projection is one
    # 2-D MXU matmul.  Tiny relayout at these sizes; for large inputs feed
    # (Bp, Ts, D) chunks straight from (B, S, D) via the index_map instead.
    x2 = jnp.transpose(x_p, (1, 0, 2)).reshape(Sp * Bp, D).astype(mxu_dtype)
    wx_t = wx_t.astype(mxu_dtype)
    wh_t = wh_t.astype(mxu_dtype)

    kernel = functools.partial(_rnn_kernel, batch_p=Bp, chunk_len=Ts)

    out = pl.pallas_call(
        kernel,
        out_shape=jax.ShapeDtypeStruct((Sp * Bp, Lp), jnp.float32),
        grid_spec=pltpu.PrefetchScalarGridSpec(
            num_scalar_prefetch=0,
            grid=(num_chunks,),                          # sequential chunks
            in_specs=[
                pl.BlockSpec((Ts * Bp, D), lambda c: (c, 0)),   # x chunk
                pl.BlockSpec((D, Lp), lambda c: (0, 0)),        # Wx
                pl.BlockSpec((Lp, Lp), lambda c: (0, 0)),       # Wh
                pl.BlockSpec((1, Lp), lambda c: (0, 0)),        # bias
            ],
            out_specs=pl.BlockSpec((Ts * Bp, Lp), lambda c: (c, 0)),
            scratch_shapes=[pltpu.VMEM((Bp, Lp), jnp.float32)],  # carried h
        ),
        compiler_params=pltpu.CompilerParams(
            # Recurrence: chunks must run in order (h carried in VMEM scratch).
            dimension_semantics=("arbitrary",),
            vmem_limit_bytes=32 * 1024 * 1024,
        ),
    )(x2, wx_t, wh_t, b2)

    # (Sp*Bp, Lp) -> (S, B, L): drop seq / batch / lane padding.
    return out.reshape(Sp, Bp, Lp)[:S, :B, :L]


def rnn_reference(x_bsd, W, b):
    """Pure-JAX reference matching the PyTorch loop."""
    B, S, D = x_bsd.shape
    L = W.shape[0]
    h = jnp.zeros((B, L), jnp.float32)
    hs = []
    for t in range(S):
        temp = jnp.concatenate([x_bsd[:, t, :], h], axis=1)  # (B, D+L)
        h = jnp.tanh(temp @ W.T + b)
        hs.append(h)
    return jnp.stack(hs, axis=0)  # (S, B, L)


if __name__ == "__main__":
    # Small shapes consistent with the module: batch=2, seq=8, dim=16, latent=32
    B, S, D, L, OUT = 2, 8, 16, 32, 10

    key = jax.random.PRNGKey(0)
    kx, kw, kb, kwo, kbo = jax.random.split(key, 5)

    x = jax.random.normal(kx, (B, S, D), dtype=jnp.float32)

    # PyTorch-style uniform +/- 1/sqrt(fan_in) init for the in_layer Linear.
    fan_in = D + L
    bound = 1.0 / np.sqrt(fan_in)
    W_in = jax.random.uniform(kw, (L, D + L), minval=-bound, maxval=bound,
                              dtype=jnp.float32)
    b_in = jax.random.uniform(kb, (L,), minval=-bound, maxval=bound,
                              dtype=jnp.float32)
    # out_layer / decode() is not invoked by forward(); built only for parity.
    bound_o = 1.0 / np.sqrt(L)
    W_out = jax.random.uniform(kwo, (OUT, L), minval=-bound_o, maxval=bound_o,
                               dtype=jnp.float32)
    b_out = jax.random.uniform(kbo, (OUT,), minval=-bound_o, maxval=bound_o,
                               dtype=jnp.float32)

    ref = rnn_reference(x, W_in, b_in)

    # f32 MXU operands (safe everywhere, tight tolerance).
    h_hist = rnn_forward(x, W_in, b_in, seq_chunk=4, mxu_dtype=jnp.float32)
    h_hist = jax.block_until_ready(h_hist)
    np.testing.assert_allclose(np.asarray(h_hist), np.asarray(ref),
                               rtol=1e-5, atol=1e-5)

    # bf16 MXU operands (v6e/v7x fast path; accumulation & tanh stay f32).
    h_bf16 = rnn_forward(x, W_in, b_in, seq_chunk=4, mxu_dtype=jnp.bfloat16)
    h_bf16 = jax.block_until_ready(h_bf16)
    np.testing.assert_allclose(np.asarray(h_bf16), np.asarray(ref),
                               rtol=5e-2, atol=5e-2)

    print("KERNEL_OK")
</pallas_src>

<mosaic_0001>
module attributes {stable_mosaic.version = 11 : i64} {
  func.func @_rnn_kernel(%arg0: i32, %arg1: memref<32x16xf32, #tpu.memory_space<vmem>>, %arg2: memref<16x128xf32, #tpu.memory_space<vmem>>, %arg3: memref<128x128xf32, #tpu.memory_space<vmem>>, %arg4: memref<1x128xf32, #tpu.memory_space<vmem>>, %arg5: memref<32x128xf32, #tpu.memory_space<vmem>>, %arg6: memref<8x128xf32, #tpu.memory_space<vmem>>) attributes {dimension_semantics = [#tpu.dimension_semantics<arbitrary>], iteration_bounds = array<i64: 2>, scalar_prefetch = 0 : i64, scratch_operands = 1 : i64, tpu.core_type = #tpu.core_type<tc>, window_params = [{transform_indices = @transform_0, window_bounds = array<i64: 32, 16>}, {pipeline_mode = #tpu.pipeline_mode<synchronous>, transform_indices = @transform_1, window_bounds = array<i64: 16, 128>}, {pipeline_mode = #tpu.pipeline_mode<synchronous>, transform_indices = @transform_2, window_bounds = array<i64: 128, 128>}, {pipeline_mode = #tpu.pipeline_mode<synchronous>, transform_indices = @transform_3, window_bounds = array<i64: 1, 128>}, {transform_indices = @transform_4, window_bounds = array<i64: 32, 128>}]} {
    %c0_i32 = arith.constant 0 : i32
    %0 = arith.cmpi eq, %arg0, %c0_i32 : i32
    %1 = arith.extui %0 : i1 to i32
    %c0_i32_0 = arith.constant 0 : i32
    %2 = arith.cmpi ne, %1, %c0_i32_0 : i32
    scf.if %2 {
      %cst_30 = arith.constant 0.000000e+00 : f32
      %49 = vector.broadcast %cst_30 : f32 to vector<8x128xf32>
      %c0_31 = arith.constant 0 : index
      %c0_32 = arith.constant 0 : index
      %50 = vector.load %arg6[%c0_31, %c0_32] : memref<8x128xf32, #tpu.memory_space<vmem>>, vector<8x128xf32>
      tpu.vector_store %arg6[%c0_31, %c0_32], %49 {strides = array<i32>} : memref<8x128xf32, #tpu.memory_space<vmem>>, vector<8x128xf32>,
    } else {
    }
    %c0 = arith.constant 0 : index
    %c0_1 = arith.constant 0 : index
    %3 = vector.load %arg1[%c0, %c0_1] : memref<32x16xf32, #tpu.memory_space<vmem>>, vector<32x16xf32>
    %c0_2 = arith.constant 0 : index
    %c0_3 = arith.constant 0 : index
    %4 = vector.load %arg2[%c0_2, %c0_3] : memref<16x128xf32, #tpu.memory_space<vmem>>, vector<16x128xf32>
    %cst = arith.constant dense<0.000000e+00> : vector<32x128xf32>
    %5 = tpu.matmul %3, %4, %cst {dimension_numbers = #tpu.dot_dimension_numbers<[1], [0], [0], [1], [0, 0, 1, 1], [], []>} : vector<32x16xf32>, vector<16x128xf32>, vector<32x128xf32> -> vector<32x128xf32>
    %c0_4 = arith.constant 0 : index
    %c0_5 = arith.constant 0 : index
    %6 = vector.load %arg4[%c0_4, %c0_5] : memref<1x128xf32, #tpu.memory_space<vmem>>, vector<1x128xf32>
    %7 = vector.broadcast %6 : vector<1x128xf32> to vector<32x128xf32>
    %8 = arith.addf %5, %7 : vector<32x128xf32>
    %c0_6 = arith.constant 0 : index
    %c0_7 = arith.constant 0 : index
    %9 = vector.load %arg5[%c0_6, %c0_7] : memref<32x128xf32, #tpu.memory_space<vmem>>, vector<32x128xf32>
    tpu.vector_store %arg5[%c0_6, %c0_7], %8 {strides = array<i32>} : memref<32x128xf32, #tpu.memory_space<vmem>>, vector<32x128xf32>,
    %c0_8 = arith.constant 0 : index
    %c0_9 = arith.constant 0 : index
    %10 = vector.load %arg3[%c0_8, %c0_9] : memref<128x128xf32, #tpu.memory_space<vmem>>, vector<128x128xf32>
    %c0_10 = arith.constant 0 : index
    %c0_11 = arith.constant 0 : index
    %11 = vector.load %arg6[%c0_10, %c0_11] : memref<8x128xf32, #tpu.memory_space<vmem>>, vector<8x128xf32>
    %c0_i32_12 = arith.constant 0 : i32
    %c8_i32 = arith.constant 8 : i32
    %12 = arith.muli %c0_i32_12, %c8_i32 : i32
    %13 = tpu.assume_multiple %12, 8 : i32
    %14 = arith.index_cast %13 : i32 to index
    %c0_13 = arith.constant 0 : index
    %15 = vector.load %arg5[%14, %c0_13] : memref<32x128xf32, #tpu.memory_space<vmem>>, vector<8x128xf32>
    %cst_14 = arith.constant dense<0.000000e+00> : vector<8x128xf32>
    %16 = tpu.matmul %11, %10, %cst_14 {dimension_numbers = #tpu.dot_dimension_numbers<[1], [0], [0], [1], [0, 0, 1, 1], [], []>} : vector<8x128xf32>, vector<128x128xf32>, vector<8x128xf32> -> vector<8x128xf32>
    %17 = arith.addf %15, %16 : vector<8x128xf32>
    %18 = math.tanh %17 : vector<8x128xf32>
    %19 = arith.index_cast %13 : i32 to index
    %c0_15 = arith.constant 0 : index
    %20 = vector.load %arg5[%19, %c0_15] : memref<32x128xf32, #tpu.memory_space<vmem>>, vector<8x128xf32>
    tpu.vector_store %arg5[%19, %c0_15], %18 {strides = array<i32>} : memref<32x128xf32, #tpu.memory_space<vmem>>, vector<8x128xf32>,
    %c1_i32 = arith.constant 1 : i32
    %c8_i32_16 = arith.constant 8 : i32
    %21 = arith.muli %c1_i32, %c8_i32_16 : i32
    %22 = tpu.assume_multiple %21, 8 : i32
    %23 = arith.index_cast %22 : i32 to index
    %c0_17 = arith.constant 0 : index
    %24 = vector.load %arg5[%23, %c0_17] : memref<32x128xf32, #tpu.memory_space<vmem>>, vector<8x128xf32>
    %cst_18 = arith.constant dense<0.000000e+00> : vector<8x128xf32>
    %25 = tpu.matmul %18, %10, %cst_18 {dimension_numbers = #tpu.dot_dimension_numbers<[1], [0], [0], [1], [0, 0, 1, 1], [], []>} : vector<8x128xf32>, vector<128x128xf32>, vector<8x128xf32> -> vector<8x128xf32>
    %26 = arith.addf %24, %25 : vector<8x128xf32>
    %27 = math.tanh %26 : vector<8x128xf32>
    %28 = arith.index_cast %22 : i32 to index
    %c0_19 = arith.constant 0 : index
    %29 = vector.load %arg5[%28, %c0_19] : memref<32x128xf32, #tpu.memory_space<vmem>>, vector<8x128xf32>
    tpu.vector_store %arg5[%28, %c0_19], %27 {strides = array<i32>} : memref<32x128xf32, #tpu.memory_space<vmem>>, vector<8x128xf32>,
    %c2_i32 = arith.constant 2 : i32
    %c8_i32_20 = arith.constant 8 : i32
    %30 = arith.muli %c2_i32, %c8_i32_20 : i32
    %31 = tpu.assume_multiple %30, 8 : i32
    %32 = arith.index_cast %31 : i32 to index
    %c0_21 = arith.constant 0 : index
    %33 = vector.load %arg5[%32, %c0_21] : memref<32x128xf32, #tpu.memory_space<vmem>>, vector<8x128xf32>
    %cst_22 = arith.constant dense<0.000000e+00> : vector<8x128xf32>
    %34 = tpu.matmul %27, %10, %cst_22 {dimension_numbers = #tpu.dot_dimension_numbers<[1], [0], [0], [1], [0, 0, 1, 1], [], []>} : vector<8x128xf32>, vector<128x128xf32>, vector<8x128xf32> -> vector<8x128xf32>
    %35 = arith.addf %33, %34 : vector<8x128xf32>
    %36 = math.tanh %35 : vector<8x128xf32>
    %37 = arith.index_cast %31 : i32 to index
    %c0_23 = arith.constant 0 : index
    %38 = vector.load %arg5[%37, %c0_23] : memref<32x128xf32, #tpu.memory_space<vmem>>, vector<8x128xf32>
    tpu.vector_store %arg5[%37, %c0_23], %36 {strides = array<i32>} : memref<32x128xf32, #tpu.memory_space<vmem>>, vector<8x128xf32>,
    %c3_i32 = arith.constant 3 : i32
    %c8_i32_24 = arith.constant 8 : i32
    %39 = arith.muli %c3_i32, %c8_i32_24 : i32
    %40 = tpu.assume_multiple %39, 8 : i32
    %41 = arith.index_cast %40 : i32 to index
    %c0_25 = arith.constant 0 : index
    %42 = vector.load %arg5[%41, %c0_25] : memref<32x128xf32, #tpu.memory_space<vmem>>, vector<8x128xf32>
    %cst_26 = arith.constant dense<0.000000e+00> : vector<8x128xf32>
    %43 = tpu.matmul %36, %10, %cst_26 {dimension_numbers = #tpu.dot_dimension_numbers<[1], [0], [0], [1], [0, 0, 1, 1], [], []>} : vector<8x128xf32>, vector<128x128xf32>, vector<8x128xf32> -> vector<8x128xf32>
    %44 = arith.addf %42, %43 : vector<8x128xf32>
    %45 = math.tanh %44 : vector<8x128xf32>
    %46 = arith.index_cast %40 : i32 to index
    %c0_27 = arith.constant 0 : index
    %47 = vector.load %arg5[%46, %c0_27] : memref<32x128xf32, #tpu.memory_space<vmem>>, vector<8x128xf32>
    tpu.vector_store %arg5[%46, %c0_27], %45 {strides = array<i32>} : memref<32x128xf32, #tpu.memory_space<vmem>>, vector<8x128xf32>,
    %c4_i32 = arith.constant 4 : i32
    %c0_28 = arith.constant 0 : index
    %c0_29 = arith.constant 0 : index
    %48 = vector.load %arg6[%c0_28, %c0_29] : memref<8x128xf32, #tpu.memory_space<vmem>>, vector<8x128xf32>
    tpu.vector_store %arg6[%c0_28, %c0_29], %45 {strides = array<i32>} : memref<8x128xf32, #tpu.memory_space<vmem>>, vector<8x128xf32>,
    return
  }
  func.func @transform_0(%arg0: i32) -> (i32, i32) {
    %c0_i32 = arith.constant 0 : i32
    %c0_i32_0 = arith.constant 0 : i32
    return %arg0, %c0_i32 : i32, i32
  }
  func.func @transform_1(%arg0: i32) -> (i32, i32) {
    %c0_i32 = arith.constant 0 : i32
    %c0_i32_0 = arith.constant 0 : i32
    %c0_i32_1 = arith.constant 0 : i32
    return %c0_i32, %c0_i32_0 : i32, i32
  }
  func.func @transform_2(%arg0: i32) -> (i32, i32) {
    %c0_i32 = arith.constant 0 : i32
    %c0_i32_0 = arith.constant 0 : i32
    %c0_i32_1 = arith.constant 0 : i32
    return %c0_i32, %c0_i32_0 : i32, i32
  }
  func.func @transform_3(%arg0: i32) -> (i32, i32) {
    %c0_i32 = arith.constant 0 : i32
    %c0_i32_0 = arith.constant 0 : i32
    %c0_i32_1 = arith.constant 0 : i32
    return %c0_i32, %c0_i32_0 : i32, i32
  }
  func.func @transform_4(%arg0: i32) -> (i32, i32) {
    %c0_i32 = arith.constant 0 : i32
    %c0_i32_0 = arith.constant 0 : i32
    return %arg0, %c0_i32 : i32, i32
  }
}

</mosaic_0001>

<bundles_post_ra>
// kernel: tpu_custom_call.1
= control target key start
LH: loop header
LB: loop body
LE: loop exit
PB: predicated region body
PF: predicated region fallthrough
CT: control target
= control target key end

     0   :  { %9 = vsyncpa [#allocation4], 0  ;;  %s1501_s0 = inlined_call_operand.vmem [shape: f32[64,16], index: 0, kind: input, shape index: {}]   ;;  %s1502_s1 = inlined_call_operand.vmem [shape: f32[16,128], index: 1, kind: input, shape index: {}]   ;;  %s1503_s2 = inlined_call_operand.hbm [shape: f32[128,128], index: 2, kind: input, shape index: {}]   ;;  %s1504_s3 = inlined_call_operand.vmem [shape: f32[1,128], index: 3, kind: input, shape index: {}]   ;;  %s1505_s4 = inlined_call_operand.hbm [shape: f32[64,128], index: 4, kind: output, shape index: {}]  }
   0x1   :  { %10 = vsyncpa [#allocation5], 0 }
   0x2   :  { %12 = vsyncpa [#allocation5 + $0x1], 0  ;;  %s1181_s15 = smov 0   ;;  %s1183_s16 = smov 0  }
   0x3   :  { %s1185_s17 = smov 0   ;;  %s1187_s18 = smov 0  }
   0x4 LB: > { %s1202_s19 = sadd.s32 4294967295, %s1145_s18   ;;  %s739_s20 = sadd.s32 4294967294, %s1145_s18   ;;  %s1145_s18 = sphi %s1187_s18, %s1514_s18   ;;  %s1141_s17 = sphi %s1185_s17, %s1513_s17   ;;  %s1137_s16 = sphi %s1183_s16, %s1512_s16   ;;  %s1133_s15 = sphi %s1181_s15, %s1511_s15  }
   0x5   : > { %s1206_s21 = sadd.s32 1, %s1145_s18   ;;  %s114_s22 = sadd.s32 1, %s1141_s17 }
   0x6   : > { %s111_s23 = ssub.s32 %s1145_s18, %s1206_s21  ;;  %p124_p0 = scmp.ne.s32.totalorder %s1141_s17, %s1137_s16 }
   0x7   : > { %p112_p1 = scmp.eq.s32.totalorder %s111_s23, 0  ;;  %p125_p2 = scmp.eq.s32.totalorder %s1202_s19, 1 }
   0x8   : > { %p130_p3 = scmp.ne.s32.totalorder %s1137_s16, %s1133_s15  ;;  %p131_p4 = scmp.eq.s32.totalorder %s739_s20, 1 }
   0x9   : > { %s1217_s24 = scalar_select %p112_p1, %s1141_s17, %s114_s22  }
   0xa   : > { %p1219_p5 = por %p125_p2, %p124_p0  ;;  %p1223_p6 = por %p131_p4, %p130_p3 }
   0xb   : > { %p740_p7 = scmp.ge.s32.totalorder %s1145_s18, 1  ;;  %p138_p8 = scmp.lt.s32.totalorder %s1145_s18, 3 }
   0xc   : > { %s1507_s26 = scalar_select %p1223_p6, 1, 0 }
   0xd   : > { %p1004_p10 = scmp.eq.s32.totalorder %s1202_s19, 0  ;;  %p1231_p11 = pnand %p740_p7, %p138_p8 }
   0xe   : > { %s1147_s28 = smov [#allocation3]  }
   0xf   : > { %s153_s29 = sshll.u32 %s1147_s28, 4  ;;  %p996_p12 = pneg %p1231_p11  ;;  %s154_s29 = int_to_ptr.vmem [resolvable:$true] %s153_s29 }
  0x10   : > { %s1066_s30 = scalar_lea.vmem %s154_s29, 2048  ;;  %p1074_p4 = scmp.lt.s32.totalorder %s154_s29, %s154_s29 }
  0x11   : > { %p997_p13 = pnand %p1004_p10, %p996_p12  ;;  %p1067_p1 = scmp.ne.s32.totalorder %s154_s29, %s1066_s30 }
  0x12   : > { %p1075_p9 = scmp.lt.s32.totalorder %s1066_s30, %s1066_s30 }
  0x13   : > { %p1057_p0 = pneg %p997_p13 }
  0x14   : > { %p1076_p6 = por %p1075_p9, %p1074_p4 }
  0x15   : > { %p1069_p2 = pnand %p1067_p1, %p1057_p0 }
  0x17   : > { %p1070_p3 = pneg %p1069_p2 }
  0x19   : > { %p1077_p7 = pnand %p1076_p6, %p1070_p3 }
  0x1b   : > { %1080 = shalt.err (!%p1077_p7)
}
  0x1c   : > { %s1148_s5 = smov 128   ;;  %s1149_s6 = smov 8  }
  0x1d   : > { %999 = dma.hbm_to_vmem [thread:$0]  (!%p997_p13), %s1503_s2, 2048, %s154_s29, [#allocation4], %s1148_s5, %s1148_s5, %s1149_s6  }
  0x1e   : > { %181 = sbr.rel (%p1231_p11) target bundleno = 930 (0x3a2), region = 36 }
  0x23   : > { %1124 = dma.done.wait (%p1004_p10), [#allocation4], 2048  }
  0x24   : > { %1126 = vsyncadd (%p1004_p10), [#allocation4], 4294965248  ;;  %s204_s9 = sand.u32 1, %s1137_s16   ;;  %s746_s10 = sshll.u32 %s1202_s19, 2 }
  0x25   : > { %s745_s11 = sshll.u32 %s204_s9, 5  ;;  %p208_p6 = scmp.lt.s32.totalorder %s746_s10, 7 }
  0x26   : > { %s1257_s22 = scalar_lea.vmem [#allocation6], %s745_s11  ;;  %p1509_p8 = scmp.ne.s32.totalorder %s1202_s19, 0 }
  0x27   : > { %s1516_s10 = smov (!%p208_p6, %s746_s10), 7 }
  0x28   : > { %s747_s12 = sshll.u32 %s1516_s10, 3  ;;  %217 = sbr.rel (%p1509_p8) target bundleno = 47 (0x2f), region = 44 }
  0x29   : > { %s1255_s20 = scalar_lea.vmem %s1501_s0, %s747_s12 }
  0x2d   : > { %v1150_v0 = vmov 0.0  }
  0x2e   : > { %218 = vst [vmem:[#allocation2] sm:$0xff] %v1150_v0 }
  0x2f PF: > { %v1261_v1 = vld [vmem:[#allocation3 + $0x78] sm:$0xff]  ;;  %v1151_v2 = vmov 0.0   ;;  %v1264_v3 = vld [vmem:[#allocation3 + $0x70] sm:$0xff]  ;;  %vm1152_vm0 = vmmov 0   ;;  %v224_v4 = vld [vmem:[%s1502_s1 + $0x8] sm:$0xff]  ;;  %vm232_vm1 = vcmask 130048  }
  0x30   : > { %850 = vmatprep.subr.mxu1 %v1151_v2  ;;  %882 = vmatprep.mubr.msk.f32.mxu1 %vm1152_vm0, %v1151_v2  ;;  %v1273_v5 = vld [vmem:[#allocation3 + $0x68] sm:$0xff]  ;;  %v223_v6 = vld [vmem:[%s1502_s1] sm:$0xff]  ;;  %v1281_v8 = vld [vmem:[#allocation3 + $0x60] sm:$0xff]  ;;  %s765_s6 = sshll.u32 %s1202_s19, 9  ;;  %s665_s7 = sshll.u32 %s1257_s22, 4  ;;  %s1456_s7 = int_to_ptr.vmem [resolvable:$true] %s665_s7 }
  0x31   : > { %851 = vmatpush3.msra.mxu1 %v1261_v1  ;;  %840 = vmatprep.subr.mxu0 %v224_v4  ;;  %v219_v7 = vld [vmem:[%s1255_s20] sm:$0xff]  ;;  %v220_v9 = vld [vmem:[%s1255_s20 + $0x8] sm:$0xff]  ;;  %v1292_v11 = vld [vmem:[#allocation3 + $0x50] sm:$0xff]  ;;  %s1454_s11 = scalar_lea.hbm %s1505_s4, %s765_s6  ;;  %s1461_s12 = scalar_lea.sflag [#allocation5], %s204_s9 }
  0x32   : > { %852 = vmatprep.subr.mxu1 %v1151_v2  ;;  %841 = vmatpush3.msra.mxu0 %v224_v4  ;;  %v1286_v10 = vld [vmem:[#allocation3 + $0x58] sm:$0xff]  ;;  %v1298_v12 = vld [vmem:[#allocation3 + $0x48] sm:$0xff]  ;;  %v1304_v13 = vld [vmem:[#allocation3 + $0x40] sm:$0xff]  ;;  %s1081_s13 = scalar_lea.vmem %s1456_s7, 512  ;;  %s1153_s19 = smov [#allocation6]  }
  0x33   : > { %853 = vmatpush3.msra.mxu1 %v1264_v3  ;;  %842 = vmatprep.subr.mxu0 %v223_v6  ;;  %v1310_v14 = vld [vmem:[#allocation3 + $0x38] sm:$0xff]  ;;  %v1316_v15 = vld [vmem:[#allocation3 + $0x30] sm:$0xff]  ;;  %v1322_v16 = vld [vmem:[#allocation3 + $0x28] sm:$0xff]  ;;  %p1082_p9 = scmp.ne.s32.totalorder %s1456_s7, %s1081_s13  ;;  %s1085_s14 = sshll.u32 %s1153_s19, 4  ;;  %s1086_s14 = int_to_ptr.vmem [resolvable:$false] %s1085_s14 }
  0x34   : > { %854 = vmatprep.subr.mxu1 %v1151_v2  ;;  %843 = vmatpush3.msra.mxu0 %v223_v6  ;;  %v1328_v17 = vld [vmem:[#allocation3 + $0x20] sm:$0xff]  ;;  %v1334_v18 = vld [vmem:[#allocation3 + $0x18] sm:$0xff]  ;;  %v1340_v19 = vld [vmem:[#allocation3 + $0x10] sm:$0xff]  ;;  %p1088_p12 = scmp.lt.s32.totalorder %s1456_s7, %s1086_s14 }
  0x35   : > { %855 = vmatpush3.msra.mxu1 %v1273_v5  ;;  %844 = vmatprep.mubr.msk.f32.mxu0 %vm232_vm1, %v219_v7  ;;  %v1346_v20 = vld [vmem:[#allocation3 + $0x8] sm:$0xff]  ;;  %v1352_v21 = vld [vmem:[#allocation3] sm:$0xff]  ;;  %v350_v22 = vld [vmem:[#allocation2] sm:$0xff]  ;;  %p1083_p10 = pnand %p1082_p9, %p1219_p5 }
  0x36   : > { %856 = vmatprep.subr.mxu1 %v1151_v2  ;;  %845 = vmatmul.mubr.msk.f32.vlgmr.msra.gmra.mxu0 %vm232_vm1, %v220_v9  ;;  %v221_v23 = vld [vmem:[%s1255_s20 + $0x10] sm:$0xff]  ;;  %v222_v24 = vld [vmem:[%s1255_s20 + $0x18] sm:$0xff]  ;;  %v749_v26 = vld [vmem:[%s1504_s3] ss:$0 sm:$0xff]  ;;  %s1087_s20 = scalar_lea.vmem %s1086_s14, 1024 }
  0x37   : > { %857 = vmatpush3.msra.mxu1 %v1281_v8  ;;  %885 = vmatprep.subr.mxu0 %v1151_v2  ;;  %p1084_p11 = pneg %p1083_p10  ;;  %p1089_p13 = scmp.lt.s32.totalorder %s1087_s20, %s1081_s13 }
  0x38   : > { %858 = vmatprep.subr.mxu1 %v1151_v2  ;;  %886 = vmatpush3.msra.mxu0 %v1261_v1 }
  0x39   : > { %859 = vmatpush3.msra.mxu1 %v1286_v10  ;;  %887 = vmatprep.subr.mxu0 %v1151_v2  ;;  %p1090_p0 = por %p1089_p13, %p1088_p12 }
  0x3a   : > { %860 = vmatprep.subr.mxu1 %v1151_v2  ;;  %888 = vmatpush3.msra.mxu0 %v1264_v3 }
  0x3b   : > { %861 = vmatpush3.msra.mxu1 %v1292_v11  ;;  %889 = vmatprep.subr.mxu0 %v1151_v2  ;;  %p1091_p1 = pnand %p1090_p0, %p1084_p11 }
  0x3c   : > { %862 = vmatprep.subr.mxu1 %v1151_v2  ;;  %890 = vmatpush3.msra.mxu0 %v1273_v5 }
  0x3d   : > { %863 = vmatpush3.msra.mxu1 %v1298_v12  ;;  %891 = vmatprep.subr.mxu0 %v1151_v2 }
  0x3e   : > { %864 = vmatprep.subr.mxu1 %v1151_v2  ;;  %892 = vmatpush3.msra.mxu0 %v1281_v8 }
  0x3f   : > { %865 = vmatpush3.msra.mxu1 %v1304_v13  ;;  %893 = vmatprep.subr.mxu0 %v1151_v2 }
  0x40   : > { %866 = vmatprep.subr.mxu1 %v1151_v2  ;;  %894 = vmatpush3.msra.mxu0 %v1286_v10 }
  0x41   : > { %867 = vmatpush3.msra.mxu1 %v1310_v14  ;;  %895 = vmatprep.subr.mxu0 %v1151_v2 }
  0x42   : > { %868 = vmatprep.subr.mxu1 %v1151_v2  ;;  %896 = vmatpush3.msra.mxu0 %v1292_v11 }
  0x43   : > { %869 = vmatpush3.msra.mxu1 %v1316_v15  ;;  %897 = vmatprep.subr.mxu0 %v1151_v2 }
  0x44   : > { %870 = vmatprep.subr.mxu1 %v1151_v2  ;;  %898 = vmatpush3.msra.mxu0 %v1298_v12 }
  0x45   : > { %871 = vmatpush3.msra.mxu1 %v1322_v16  ;;  %899 = vmatprep.subr.mxu0 %v1151_v2 }
  0x46   : > { %872 = vmatprep.subr.mxu1 %v1151_v2  ;;  %900 = vmatpush3.msra.mxu0 %v1304_v13 }
  0x47   : > { %873 = vmatpush3.msra.mxu1 %v1328_v17  ;;  %901 = vmatprep.subr.mxu0 %v1151_v2 }
  0x48   : > { %874 = vmatprep.subr.mxu1 %v1151_v2  ;;  %902 = vmatpush3.msra.mxu0 %v1310_v14 }
  0x49   : > { %875 = vmatpush3.msra.mxu1 %v1334_v18  ;;  %903 = vmatprep.subr.mxu0 %v1151_v2 }
  0x4a   : > { %876 = vmatprep.subr.mxu1 %v1151_v2  ;;  %904 = vmatpush3.msra.mxu0 %v1316_v15 }
  0x4b   : > { %877 = vmatpush3.msra.mxu1 %v1340_v19  ;;  %905 = vmatprep.subr.mxu0 %v1151_v2 }
  0x4c   : > { %878 = vmatprep.subr.mxu1 %v1151_v2  ;;  %906 = vmatpush3.msra.mxu0 %v1322_v16 }
  0x4d   : > { %879 = vmatpush3.msra.mxu1 %v1346_v20  ;;  %907 = vmatprep.subr.mxu0 %v1151_v2 }
  0x4e   : > { %880 = vmatprep.subr.mxu1 %v1151_v2  ;;  %908 = vmatpush3.msra.mxu0 %v1328_v17 }
  0x4f   : > { %881 = vmatpush3.msra.mxu1 %v1352_v21  ;;  %909 = vmatprep.subr.mxu0 %v1151_v2 }
  0x50   : > { %883 = vmatmul.mubr.f32.vlgmr.msra.gmra.mxu1 %v350_v22  ;;  %910 = vmatpush3.msra.mxu0 %v1334_v18 }
  0x51   : > { %920 = vmatprep.subr.mxu1 %v1151_v2  ;;  %911 = vmatprep.subr.mxu0 %v1151_v2 }
  0x52   : > { %921 = vmatpush3.msra.mxu1 %v1261_v1  ;;  %912 = vmatpush3.msra.mxu0 %v1340_v19 }
  0x53   : > { %922 = vmatprep.subr.mxu1 %v1151_v2  ;;  %913 = vmatprep.subr.mxu0 %v1151_v2 }
  0x54   : > { %923 = vmatpush3.msra.mxu1 %v1264_v3  ;;  %914 = vmatpush3.msra.mxu0 %v1346_v20 }
  0x55   : > { %924 = vmatprep.subr.mxu1 %v1151_v2  ;;  %915 = vmatprep.subr.mxu0 %v1151_v2 }
  0x56   : > { %925 = vmatpush3.msra.mxu1 %v1273_v5  ;;  %916 = vmatpush3.msra.mxu0 %v1352_v21 }
  0x57   : > { %926 = vmatprep.subr.mxu1 %v1151_v2  ;;  %952 = vmatprep.mubr.msk.f32.mxu1 %vm1152_vm0, %v1151_v2 }
  0x58   : > { %927 = vmatpush3.msra.mxu1 %v1281_v8  ;;  %955 = vmatprep.subr.mxu0 %v1151_v2 }
  0x59   : > { %928 = vmatprep.subr.mxu1 %v1151_v2  ;;  %847 = vmatprep.mubr.msk.f32.mxu0 %vm232_vm1, %v221_v23 }
  0x5a   : > { %929 = vmatpush3.msra.mxu1 %v1286_v10  ;;  %848 = vmatmul.mubr.msk.f32.gmra.mxu0 %vm232_vm1, %v222_v24 }
  0x5b   : > { %930 = vmatprep.subr.mxu1 %v1151_v2  ;;  %917 = vmatprep.mubr.msk.f32.mxu0 %vm1152_vm0, %v1151_v2 }
  0x5c   : > { %931 = vmatpush3.msra.mxu1 %v1292_v11 }
  0x5d   : > { %932 = vmatprep.subr.mxu1 %v1151_v2 }
  0x5e   : > { %933 = vmatpush3.msra.mxu1 %v1298_v12 }
  0x5f   : > { %934 = vmatprep.subr.mxu1 %v1151_v2 }
  0x60   : > { %935 = vmatpush3.msra.mxu1 %v1304_v13 }
  0x61   : > { %936 = vmatprep.subr.mxu1 %v1151_v2 }
  0x62   : > { %937 = vmatpush3.msra.mxu1 %v1310_v14 }
  0x63   : > { %938 = vmatprep.subr.mxu1 %v1151_v2 }
  0x64   : > { %939 = vmatpush3.msra.mxu1 %v1316_v15 }
  0x65   : > { %940 = vmatprep.subr.mxu1 %v1151_v2 }
  0x66   : > { %941 = vmatpush3.msra.mxu1 %v1322_v16 }
  0x67   : > { %942 = vmatprep.subr.mxu1 %v1151_v2 }
  0x68   : > { %943 = vmatpush3.msra.mxu1 %v1328_v17 }
  0x69   : > { %944 = vmatprep.subr.mxu1 %v1151_v2 }
  0x6a   : > { %945 = vmatpush3.msra.mxu1 %v1334_v18 }
  0x6b   : > { %946 = vmatprep.subr.mxu1 %v1151_v2 }
  0x6c   : > { %947 = vmatpush3.msra.mxu1 %v1340_v19 }
  0x6d   : > { %948 = vmatprep.subr.mxu1 %v1151_v2 }
  0x6e   : > { %949 = vmatpush3.msra.mxu1 %v1346_v20 }
  0x6f   : > { %950 = vmatprep.subr.mxu1 %v1151_v2 }
  0x70   : > { %951 = vmatpush3.msra.mxu1 %v1352_v21 }
  0xf6   : > { %v846_v25 = vpop.f32.mrf.mxu0 }
  0xf7   : > { %v317_v35 = vadd.f32 %v846_v25, %v749_v26 }
  0xf8   : > { %v311_v27 = vpop.f32.mrf.mxu0 }
  0xf9   : > { %v312_v28 = vadd.f32 %v749_v26, %v311_v27 }
 0x110   : > { %v418_v29 = vpop.f32.mrf.mxu1 }
 0x111   : > { %v422_v30 = vadd.f32 %v418_v29, %v312_v28 }
 0x112   : > { %v884_v31 = vpop.f32.mrf.mxu1 }
 0x113   : > { %1047 = vtanh.f32 %v422_v30 }
 0x11a   : > { %v849_v33 = vpop.f32.mrf.mxu0 }
 0x11b   : > { %v327_v45 = vadd.f32 %v849_v33, %v749_v26 }
 0x11c   : > { %v321_v34 = vpop.f32.mrf.mxu0 }
 0x11d   : > { %v322_v40 = vadd.f32 %v749_v26, %v321_v34 }
 0x120   : > { %v1048_v32 = vpop.eup %1047 }
 0x121   : > { %424 = vst [vmem:[%s1257_s22] sm:$0xff] %v1048_v32  ;;  %918 = vmatmul.mubr.f32.vlgmr.msra.gmra.mxu0 %v1048_v32 }
 0x122   : > { %956 = vmatpush3.msra.mxu0 %v1261_v1  ;;  %987 = vmatprep.mubr.msk.f32.mxu0 %vm1152_vm0, %v1151_v2 }
 0x123   : > { %957 = vmatprep.subr.mxu0 %v1151_v2 }
 0x124   : > { %958 = vmatpush3.msra.mxu0 %v1264_v3 }
 0x125   : > { %959 = vmatprep.subr.mxu0 %v1151_v2 }
 0x126   : > { %960 = vmatpush3.msra.mxu0 %v1273_v5 }
 0x127   : > { %961 = vmatprep.subr.mxu0 %v1151_v2 }
 0x128   : > { %962 = vmatpush3.msra.mxu0 %v1281_v8 }
 0x129   : > { %963 = vmatprep.subr.mxu0 %v1151_v2 }
 0x12a   : > { %964 = vmatpush3.msra.mxu0 %v1286_v10 }
 0x12b   : > { %965 = vmatprep.subr.mxu0 %v1151_v2 }
 0x12c   : > { %966 = vmatpush3.msra.mxu0 %v1292_v11 }
 0x12d   : > { %967 = vmatprep.subr.mxu0 %v1151_v2 }
 0x12e   : > { %968 = vmatpush3.msra.mxu0 %v1298_v12 }
 0x12f   : > { %969 = vmatprep.subr.mxu0 %v1151_v2 }
 0x130   : > { %970 = vmatpush3.msra.mxu0 %v1304_v13 }
 0x131   : > { %971 = vmatprep.subr.mxu0 %v1151_v2 }
 0x132   : > { %972 = vmatpush3.msra.mxu0 %v1310_v14 }
 0x133   : > { %973 = vmatprep.subr.mxu0 %v1151_v2 }
 0x134   : > { %974 = vmatpush3.msra.mxu0 %v1316_v15 }
 0x135   : > { %975 = vmatprep.subr.mxu0 %v1151_v2 }
 0x136   : > { %976 = vmatpush3.msra.mxu0 %v1322_v16 }
 0x137   : > { %977 = vmatprep.subr.mxu0 %v1151_v2 }
 0x138   : > { %978 = vmatpush3.msra.mxu0 %v1328_v17 }
 0x139   : > { %979 = vmatprep.subr.mxu0 %v1151_v2 }
 0x13a   : > { %980 = vmatpush3.msra.mxu0 %v1334_v18 }
 0x13b   : > { %981 = vmatprep.subr.mxu0 %v1151_v2 }
 0x13c   : > { %982 = vmatpush3.msra.mxu0 %v1340_v19 }
 0x13d   : > { %983 = vmatprep.subr.mxu0 %v1151_v2 }
 0x13e   : > { %984 = vmatpush3.msra.mxu0 %v1346_v20 }
 0x13f   : > { %985 = vmatprep.subr.mxu0 %v1151_v2 }
 0x140   : > { %986 = vmatpush3.msra.mxu0 %v1352_v21 }
 0x1e1   : > { %v493_v36 = vpop.f32.mrf.mxu0 }
 0x1e2   : > { %v497_v37 = vadd.f32 %v493_v36, %v317_v35 }
 0x1e3   : > { %v919_v38 = vpop.f32.mrf.mxu0 }
 0x1e4   : > { %1049 = vtanh.f32 %v497_v37 }
 0x1f1   : > { %v1050_v39 = vpop.eup %1049 }
 0x1f2   : > { %755 = vst [vmem:[%s1257_s22 + $0x8] sm:$0xff] %v1050_v39  ;;  %953 = vmatmul.mubr.f32.vlgmr.msra.gmra.mxu1 %v1050_v39 }
 0x2b2   : > { %v568_v41 = vpop.f32.mrf.mxu1 }
 0x2b3   : > { %v572_v42 = vadd.f32 %v568_v41, %v322_v40 }
 0x2b4   : > { %v954_v43 = vpop.f32.mrf.mxu1 }
 0x2b5   : > { %1051 = vtanh.f32 %v572_v42 }
 0x2c2   : > { %v1052_v44 = vpop.eup %1051 }
 0x2c3   : > { %757 = vst [vmem:[%s1257_s22 + $0x10] sm:$0xff] %v1052_v44  ;;  %988 = vmatmul.mubr.f32.vlgmr.msra.gmra.mxu0 %v1052_v44 }
 0x383   : > { %v643_v46 = vpop.f32.mrf.mxu0 }
 0x384   : > { %v647_v47 = vadd.f32 %v643_v46, %v327_v45 }
 0x385   : > { %v989_v48 = vpop.f32.mrf.mxu0 }
 0x386   : > { %1053 = vtanh.f32 %v647_v47 }
 0x393   : > { %v1054_v49 = vpop.eup %1053 }
 0x394   : > { %759 = vst [vmem:[%s1257_s22 + $0x18] sm:$0xff] %v1054_v49  ;;  %650 = vst [vmem:[#allocation2] sm:$0xff] %v1054_v49 }
 0x395   : > { %1094 = shalt.err (!%p1091_p1)
}
 0x396   : > { %s1095_s9 = scalar_lea.hbm %s1454_s11, 512  ;;  %s1099_s27 = scalar_lea.hbm %s1505_s4, 1024 }
 0x397   : > { %p1096_p2 = scmp.ne.s32.totalorder %s1454_s11, %s1095_s9  ;;  %p1100_p7 = scmp.lt.s32.totalorder %s1454_s11, %s1505_s4 }
 0x398   : > { %p1101_p6 = scmp.lt.s32.totalorder %s1099_s27, %s1095_s9 }
 0x399   : > { %p1097_p3 = pnand %p1096_p2, %p1219_p5 }
 0x39a   : > { %p1102_p8 = por %p1101_p6, %p1100_p7 }
 0x39b   : > { %p1098_p4 = pneg %p1097_p3 }
 0x39d   : > { %p1103_p9 = pnand %p1102_p8, %p1098_p4 }
 0x39f   : > { %1106 = shalt.err (!%p1103_p9)
}
 0x3a0   : > { %s1154_s30 = smov 128   ;;  %s1155_s5 = smov 8  }
 0x3a1   : > { %994 = dma.vmem_to_hbm [thread:$0]  (%p1219_p5), %s1456_s7, 512, %s1454_s11, %s1461_s12, %s1154_s30, %s1154_s30, %s1155_s5  }
 0x3a2 PF: > { %p1006_p10 = scmp.ge.s32.totalorder %s1145_s18, 2  ;;  %s680_s6 = sand.u32 1, %s1133_s15  }
 0x3a3   : > { %p1510_p11 = scmp.ne.s32.totalorder %s1507_s26, 0  ;;  %s681_s8 = scalar_lea.sflag [#allocation5], %s680_s6 }
 0x3a5   : > { %p1001_p12 = pnand %p1006_p10, %p1510_p11 }
 0x3a7   : > { %p1002_p13 = pneg %p1001_p12 }
 0x3a9   : > { %1128 = dma.done.wait (%p1002_p13), %s681_s8, 512  }
 0x3aa   : > { %1130 = vsyncadd (%p1002_p13), %s681_s8, 4294966784  ;;  %p15_p0 = scmp.ge.s32.totalorder %s1206_s21, 4   ;;  %s1511_s15 = smov %s1137_s16 }
 0x3ab   : > { %s1512_s16 = smov %s1141_s17  ;;  %s1513_s17 = smov %s1217_s24 }
 0x3ac   : > { %s1514_s18 = smov %s1206_s21  ;;  %17 = sbr.rel (!%p15_p0) target bundleno = 4 (0x4), region = 83 }
 0x3b1   :  { %686 = vsyncpa [#allocation4], 1 }
 0x3b2   :  { %688 = vsyncpa [#allocation4 + $0x1], 1 }
 0x3b3   :  { %689 = vsyncpa [#allocation5], 1 }
 0x3b4   :  { %691 = vsyncpa [#allocation5 + $0x1], 1 }

</bundles_post_ra>
